<compile_context>
chip_gen: v6e
topology: v6e:2x2x1
jax: 0.10.0
libtpu: 0.0.40
codegen_flags: <defaults>
</compile_context>

<pallas_src>
import math
from functools import partial

import jax
import jax.numpy as jnp
from jax.experimental import pallas as pl
from jax.experimental.pallas import tpu as pltpu


def _eca_kernel(w_ref, x_ref, o_ref, *, ks):
    # w_ref: SMEM (ks,) f32 conv taps
    # x_ref: (Bblk, C, HW) input slab     o_ref: (Bblk, C, HW) output slab
    bblk, C, _ = x_ref.shape
    pad = ks // 2

    x = x_ref[...].astype(jnp.float32)                     # f32 math throughout

    # AdaptiveAvgPool2d(1): mean over spatial positions (lane-axis reduce).
    pooled = jnp.mean(x, axis=-1)                           # (Bblk, C)

    # Conv1d(1, 1, ks, padding=ks//2, bias=False) along the channel axis,
    # as `ks` shifted multiply-adds on the VPU (zero-padded cross-correlation,
    # identical to PyTorch's op order: pool first, then conv).
    if pad:
        z = jnp.zeros((bblk, pad), jnp.float32)
        pp = jnp.concatenate([z, pooled, z], axis=-1)       # (Bblk, C + 2*pad)
    else:
        pp = pooled
    y = jnp.zeros((bblk, C), jnp.float32)
    for t in range(ks):                                     # static, tiny k
        y = y + w_ref[t] * pp[:, t:t + C]

    # Sigmoid gate, then rescale the input (broadcast over the lane axis).
    gate = jax.nn.sigmoid(y)                                # (Bblk, C)
    o_ref[...] = (x * gate[:, :, None]).astype(o_ref.dtype)


def eca_kernel_size(in_channel, gamma=2, b=1):
    k = int(abs((math.log(in_channel, 2) + b) / gamma))
    return k if k % 2 else k + 1


def _pick_bblk(B, per_image_bytes, target_bytes=2 << 20):
    """Largest divisor of B whose slab is ~target_bytes, keeping >=2 grid steps
    when B >= 2 so both TensorCores (v7x) get work."""
    bblk = max(1, min(B, target_bytes // max(int(per_image_bytes), 1)))
    if B >= 2:
        bblk = max(1, min(bblk, B // 2))
    while B % bblk:
        bblk -= 1
    return bblk


def eca_forward(x, conv_w):
    """x: (B, C, H, W), conv_w: (kernel_size,) -> (B, C, H, W), same dtype as x."""
    B, C, H, W = x.shape
    HW = H * W
    x_flat = x.reshape(B, C, HW)            # contiguous merge -> free reshape
    ks = conv_w.shape[0]

    itemsize = jnp.dtype(x.dtype).itemsize
    bblk = _pick_bblk(B, C * HW * itemsize)
    nb = B // bblk

    out = pl.pallas_call(
        partial(_eca_kernel, ks=ks),
        out_shape=jax.ShapeDtypeStruct((B, C, HW), x.dtype),
        grid=(nb,),
        in_specs=[
            pl.BlockSpec(memory_space=pltpu.MemorySpace.SMEM),      # conv taps
            pl.BlockSpec((bblk, C, HW), lambda b: (b, 0, 0)),       # x slab
        ],
        out_specs=pl.BlockSpec((bblk, C, HW), lambda b: (b, 0, 0)),
        compiler_params=pltpu.CompilerParams(
            dimension_semantics=("parallel",)),
    )(conv_w.astype(jnp.float32), x_flat)
    return out.reshape(B, C, H, W)


if __name__ == "__main__":
    key = jax.random.PRNGKey(0)
    kx, kw = jax.random.split(key)

    # C=32 gives the module's k = int(|(log2(32)+1)/2|) = 3 -> kernel_size=3,
    # padding=1 (a non-degenerate ECA conv); spatial 16x16, batch 2.
    B, C, H, W = 2, 32, 16, 16
    ks = eca_kernel_size(C)

    x = jax.random.normal(kx, (B, C, H, W), jnp.float32)
    conv_w = 0.3 * jax.random.normal(kw, (ks,), jnp.float32)

    fn = jax.jit(eca_forward)
    out = fn(x, conv_w)
    jax.block_until_ready(out)

    # Pure-JAX reference (mirrors the PyTorch forward exactly).
    pooled = jnp.mean(x, axis=(2, 3))                               # (B, C)
    pad = ks // 2
    padded = jnp.pad(pooled, ((0, 0), (pad, pad)))
    yref = sum(conv_w[t] * padded[:, t:t + C] for t in range(ks))   # (B, C)
    ref = jax.nn.sigmoid(yref)[:, :, None, None] * x

    assert out.shape == (B, C, H, W), out.shape
    assert out.dtype == x.dtype, out.dtype
    assert bool(jnp.all(jnp.isfinite(out)))
    assert bool(jnp.allclose(out, ref, atol=1e-5, rtol=1e-5))
    print("KERNEL_OK")
</pallas_src>

<mosaic_0001>
module attributes {stable_mosaic.version = 11 : i64} {
  func.func @_eca_kernel(%arg0: i32, %arg1: memref<3xf32, #tpu.memory_space<smem>>, %arg2: memref<1x32x256xf32, #tpu.memory_space<vmem>>, %arg3: memref<1x32x256xf32, #tpu.memory_space<vmem>>) attributes {dimension_semantics = [#tpu.dimension_semantics<parallel>], iteration_bounds = array<i64: 2>, scalar_prefetch = 0 : i64, scratch_operands = 0 : i64, tpu.core_type = #tpu.core_type<tc>, window_params = [{transform_indices = @transform_0, window_bounds = array<i64: 3>}, {transform_indices = @transform_1, window_bounds = array<i64: 1, 32, 256>}, {transform_indices = @transform_2, window_bounds = array<i64: 1, 32, 256>}]} {
    %c0 = arith.constant 0 : index
    %c0_0 = arith.constant 0 : index
    %c0_1 = arith.constant 0 : index
    %0 = vector.load %arg2[%c0, %c0_0, %c0_1] : memref<1x32x256xf32, #tpu.memory_space<vmem>>, vector<1x32x256xf32>
    %cst = arith.constant dense<0.000000e+00> : vector<1x32xf32>
    %1 = vector.multi_reduction <add>, %0, %cst [2] : vector<1x32x256xf32> to vector<1x32xf32>
    %cst_2 = arith.constant 2.560000e+02 : f32
    %2 = vector.broadcast %cst_2 : f32 to vector<1x32xf32>
    %3 = arith.divf %1, %2 : vector<1x32xf32>
    %cst_3 = arith.constant 0.000000e+00 : f32
    %4 = vector.broadcast %cst_3 : f32 to vector<1x1xf32>
    %5 = tpu.concatenate %4, %3, %4 in 1 : vector<1x1xf32>, vector<1x32xf32>, vector<1x1xf32> -> vector<1x34xf32>
    %cst_4 = arith.constant 0.000000e+00 : f32
    %6 = vector.broadcast %cst_4 : f32 to vector<1x32xf32>
    %c0_5 = arith.constant 0 : index
    %7 = memref.load %arg1[%c0_5] : memref<3xf32, #tpu.memory_space<smem>>
    %8 = vector.extract_strided_slice %5 {offsets = [0, 0], sizes = [1, 32], strides = [1, 1]} : vector<1x34xf32> to vector<1x32xf32>
    %9 = vector.broadcast %7 : f32 to vector<1x32xf32>
    %10 = arith.mulf %9, %8 : vector<1x32xf32>
    %11 = arith.addf %6, %10 : vector<1x32xf32>
    %c1 = arith.constant 1 : index
    %12 = memref.load %arg1[%c1] : memref<3xf32, #tpu.memory_space<smem>>
    %13 = vector.extract_strided_slice %5 {offsets = [0, 1], sizes = [1, 32], strides = [1, 1]} : vector<1x34xf32> to vector<1x32xf32>
    %14 = vector.broadcast %12 : f32 to vector<1x32xf32>
    %15 = arith.mulf %14, %13 : vector<1x32xf32>
    %16 = arith.addf %11, %15 : vector<1x32xf32>
    %c2 = arith.constant 2 : index
    %17 = memref.load %arg1[%c2] : memref<3xf32, #tpu.memory_space<smem>>
    %18 = vector.extract_strided_slice %5 {offsets = [0, 2], sizes = [1, 32], strides = [1, 1]} : vector<1x34xf32> to vector<1x32xf32>
    %19 = vector.broadcast %17 : f32 to vector<1x32xf32>
    %20 = arith.mulf %19, %18 : vector<1x32xf32>
    %21 = arith.addf %16, %20 : vector<1x32xf32>
    %22 = arith.negf %21 : vector<1x32xf32>
    %23 = math.exp %22 : vector<1x32xf32>
    %cst_6 = arith.constant 1.000000e+00 : f32
    %24 = vector.broadcast %cst_6 : f32 to vector<1x32xf32>
    %25 = arith.addf %24, %23 : vector<1x32xf32>
    %26 = arith.divf %24, %25 : vector<1x32xf32>
    %27 = vector.shape_cast %26 : vector<1x32xf32> to vector<1x32x1xf32>
    %28 = vector.broadcast %27 : vector<1x32x1xf32> to vector<1x32x256xf32>
    %29 = arith.mulf %0, %28 : vector<1x32x256xf32>
    %c0_7 = arith.constant 0 : index
    %c0_8 = arith.constant 0 : index
    %c0_9 = arith.constant 0 : index
    %30 = vector.load %arg3[%c0_7, %c0_8, %c0_9] : memref<1x32x256xf32, #tpu.memory_space<vmem>>, vector<1x32x256xf32>
    tpu.vector_store %arg3[%c0_7, %c0_8, %c0_9], %29 {strides = array<i32>} : memref<1x32x256xf32, #tpu.memory_space<vmem>>, vector<1x32x256xf32>,
    return
  }
  func.func @transform_0(%arg0: i32) -> i32 {
    %c0_i32 = arith.constant 0 : i32
    %c0_i32_0 = arith.constant 0 : i32
    return %c0_i32 : i32
  }
  func.func @transform_1(%arg0: i32) -> (i32, i32, i32) {
    %c0_i32 = arith.constant 0 : i32
    %c0_i32_0 = arith.constant 0 : i32
    %c0_i32_1 = arith.constant 0 : i32
    return %arg0, %c0_i32, %c0_i32_0 : i32, i32, i32
  }
  func.func @transform_2(%arg0: i32) -> (i32, i32, i32) {
    %c0_i32 = arith.constant 0 : i32
    %c0_i32_0 = arith.constant 0 : i32
    %c0_i32_1 = arith.constant 0 : i32
    return %arg0, %c0_i32, %c0_i32_0 : i32, i32, i32
  }
}

</mosaic_0001>

<bundles_post_ra>
// kernel: eca_forward.1
= control target key start
LH: loop header
LB: loop body
LE: loop exit
PB: predicated region body
PF: predicated region fallthrough
CT: control target
= control target key end

     0   :  { %7 = vsyncpa [#allocation3], 0  ;;  %s436_s9 = smov 0   ;;  %s506_s0 = inlined_call_operand.vmem [shape: f32[3], index: 0, kind: input, shape index: {}]   ;;  %s507_s1 = inlined_call_operand.vmem [shape: f32[2,32,256], index: 1, kind: input, shape index: {}]   ;;  %s508_s2 = inlined_call_operand.vmem [shape: f32[2,32,256], index: 2, kind: output, shape index: {}]  }
   0x1 LB: > { %s348_s10 = sadd.s32 4294967295, %s416_s9   ;;  %p350_p0 = scmp.ge.s32.totalorder %s416_s9, 1  ;;  %s416_s9 = sphi %s436_s9, %s13_s9  }
   0x2   : > { %p91_p1 = scmp.lt.s32.totalorder %s416_s9, 3  ;;  %s104_s13 = sshll.u32 %s506_s0, 4  ;;  %s105_s13 = int_to_ptr.vmem [resolvable:$true] %s104_s13 }
   0x3   : > { %p374_p3 = scmp.eq.s32.totalorder %s348_s10, 0  ;;  %s391_s15 = scalar_lea.vmem %s105_s13, 16 }
   0x4   : > { %p447_p2 = pnand %p350_p0, %p91_p1  ;;  %p392_p6 = scmp.ne.s32.totalorder %s105_s13, %s391_s15 }
   0x5   : > { %p399_p10 = scmp.lt.s32.totalorder %s105_s13, %s105_s13  ;;  %p400_p11 = scmp.lt.s32.totalorder %s391_s15, %s391_s15 }
   0x6   : > { %p370_p4 = pneg %p447_p2 }
   0x7   : > { %p401_p12 = por %p400_p11, %p399_p10 }
   0x8   : > { %p371_p5 = pnand %p374_p3, %p370_p4 }
   0xa   : > { %p393_p7 = pneg %p371_p5 }
   0xc   : > { %p394_p8 = pnand %p393_p7, %p392_p6 }
   0xe   : > { %p395_p9 = pneg %p394_p8 }
  0x10   : > { %p402_p13 = pnand %p401_p12, %p395_p9 }
  0x12   : > { %405 = shalt.err (!%p402_p13)
}
  0x13   : > { %s418_s16 = smov [#allocation2]   ;;  %125 = sbr.rel (%p447_p2) target bundleno = 467 (0x1d3), region = 28 }
  0x14   : > { %373 = dma.vmem_to_smem (!%p371_p5), %s105_s13, 16, %s418_s16, [#allocation3]  }
  0x18   : > { %411 = dma.done.wait (%p374_p3), [#allocation3], 16  }
  0x19   : > { %413 = vsyncadd (%p374_p3), [#allocation3], 4294967280 }
  0x1a   : > { %131 = sfence }
  0x1b   : > { %p148_p0 = scmp.lt.s32.totalorder %s348_s10, 1  ;;  %v187_v12 = vlaneseq  ;;  %s360_s21 = sld [smem:[#allocation2 + $0x2]]  ;;  %vm199_vm0 = vcmask 138312   ;;  %vm206_vm1 = vcmask 203912   ;;  %vm213_vm2 = vcmask 269512  }
  0x1c   : > { %s359_s22 = sld [smem:[#allocation2 + $0x1]]  ;;  %vm216_vm3 = vcmask 7168   ;;  %vm218_vm4 = vcmask 269312   ;;  %s419_s23 = smov 126  }
  0x1d   : > { %s511_s10 = smov (!%p148_p0, %s348_s10), 1  ;;  %v188_v13 = vand.u32 127, %v187_v12  ;;  %v191_v15 = vshrl.u32 %v187_v12, 7  ;;  %s420_s24 = smov 127  }
  0x1e   : > { %s364_s17 = sshll.u32 %s511_s10, 6  ;;  %s220_s25 = sld [smem:[#allocation2]] }
  0x1f   : > { %s152_s20 = scalar_lea.vmem %s507_s1, %s364_s17  ;;  %v189_v14 = vadd.s32 4294967295, %v188_v13  ;;  %v194_v16 = vadd.s32 4294967287, %v188_v13  ;;  %v201_v18 = vadd.s32 4294967279, %v188_v13  ;;  %v208_v19 = vadd.s32 4294967271, %v188_v13  ;;  %s157_s28 = scalar_lea.vmem %s508_s2, %s364_s17 }
  0x20   : > { %v466_v0 = vld [vmem:[%s152_s20] sm:$0xff]  ;;  %v468_v1 = vld [vmem:[%s152_s20 + $0x8] sm:$0xff]  ;;  %v476_v5 = vld [vmem:[%s152_s20 + $0x10] sm:$0xff]  ;;  %v248_v53 = vsub.s32 0, %v191_v15 }
  0x21   : > { %v470_v2 = vld [vmem:[%s152_s20 + $0x20] sm:$0xff]  ;;  %v166_v3 = vadd.f32 %v468_v1, %v466_v0  ;;  %v474_v4 = vld [vmem:[%s152_s20 + $0x28] sm:$0xff]  ;;  %v478_v6 = vld [vmem:[%s152_s20 + $0x18] sm:$0xff]  ;;  %v192_v21 = vsub.s32 %v189_v14, %v191_v15  ;;  %v197_v23 = vsub.s32 %v194_v16, %v191_v15  ;;  %v204_v24 = vsub.s32 %v201_v18, %v191_v15 }
  0x22   : > { %v172_v7 = vadd.f32 %v474_v4, %v470_v2  ;;  %v482_v8 = vld [vmem:[%s152_s20 + $0x30] sm:$0xff]  ;;  %v484_v9 = vld [vmem:[%s152_s20 + $0x38] sm:$0xff]  ;;  %v169_v10 = vadd.f32 %v478_v6, %v476_v5  ;;  %v211_v27 = vsub.s32 %v208_v19, %v191_v15  ;;  %v233_v38 = vstv %s360_s21 }
  0x23   : > { %167 = vadd.xlane.f32.xlu0 %v166_v3  ;;  %v175_v11 = vadd.f32 %v484_v9, %v482_v8  ;;  %v225_v39 = vstv %s359_s22 }
  0x24   : > { %173 = vadd.xlane.f32.xlu1 %v172_v7  ;;  %v221_v44 = vstv %s220_s25 }
  0x27   : > { %170 = vadd.xlane.f32.xlu0 %v169_v10 }
  0x28   : > { %176 = vadd.xlane.f32.xlu1 %v175_v11 }
  0xac   : > { %v168_v17 = vpop.xlane.xlu0 %167 }
  0xad   : > { %v174_v20 = vpop.xlane.xlu1 %173  ;;  %v179_v22 = vmul.f32 0.00390625, %v168_v17 }
  0xae   : > { %v181_v25 = vmul.f32 0.00390625, %v174_v20 }
  0xaf   : > { %v193_v31 = vrot.slane %v179_v22, %v192_v21 }
  0xb0   : > { %v171_v26 = vpop.xlane.xlu0 %170  ;;  %v205_v33 = vrot.slane %v181_v25, %v204_v24 }
  0xb1   : > { %v180_v28 = vmul.f32 0.00390625, %v171_v26  ;;  %v177_v29 = vpop.xlane.xlu1 %176 }
  0xb2   : > { %v182_v30 = vmul.f32 0.00390625, %v177_v29 }
  0xb3   : > { %v198_v32 = vrot.slane %v180_v28, %v197_v23 }
  0xb4   : > { %v212_v34 = vrot.slane %v182_v30, %v211_v27 }
  0xb5   : > { %v200_v35 = vsel %vm199_vm0, %v198_v32, %v193_v31 }
  0xb6   : > { %v207_v36 = vsel %vm206_vm1, %v205_v33, %v200_v35 }
  0xb7   : > { %v214_v37 = vsel %vm213_vm2, %v212_v34, %v207_v36 }
  0xb8   : > { %v217_v40 = vsel %vm216_vm3, 0.0, %v214_v37 }
  0xb9   : > { %v219_v41 = vsel %vm218_vm4, %v217_v40, 0.0 }
  0xba   : > { %v234_v42 = vmul.f32 %v233_v38, %v219_v41  ;;  %v226_v43 = vmul.f32 %v225_v39, %v219_v41  ;;  %v222_v45 = vmul.f32 %v221_v44, %v219_v41 }
  0xbc   : > { %236 = vrot.lane.b32.xlu1 %v234_v42, %s419_s23  ;;  %228 = vrot.lane.b32.xlu0 %v226_v43, %s420_s24 }
 0x12e   : > { %v229_v46 = vpop.permute.xlu0 %228  ;;  %v237_v48 = vpop.permute.xlu1 %236 }
 0x12f   : > { %v231_v47 = vadd.f32 %v229_v46, %v222_v45 }
 0x131   : > { %v239_v49 = vadd.f32 %v237_v48, %v231_v47 }
 0x133   : > { %v361_v50 = vmul.f32 -1.442695, %v239_v49 }
 0x135   : > { %387 = vpow2.f32 %v361_v50 }
 0x142   : > { %v388_v51 = vpop.eup %387 }
 0x143   : > { %v243_v52 = vadd.f32 1.0, %v388_v51 }
 0x145   : > { %389 = vrcp.f32 %v243_v52 }
 0x152   : > { %v390_v54 = vpop.eup %389 }
 0x153   : > { %v249_v55 = vrot.slane %v390_v54, %v248_v53 }
 0x155   : > { %259 = vbcast.lane.b32.xlu0 %v249_v55, 272  ;;  %251 = vbcast.lane.b32.xlu1 %v249_v55, 256 }
 0x159   : > { %255 = vbcast.lane.b32.xlu1 %v249_v55, 264 }
 0x15d   : > { %263 = vbcast.lane.b32.xlu1 %v249_v55, 280 }
 0x1c7   : > { %v260_v56 = vpop.permute.xlu0 %259  ;;  %v252_v57 = vpop.permute.xlu1 %251 }
 0x1c8   : > { %v269_v58 = vmul.f32 %v260_v56, %v470_v2  ;;  %v270_v59 = vmul.f32 %v260_v56, %v474_v4  ;;  %v265_v60 = vmul.f32 %v252_v57, %v466_v0  ;;  %v266_v61 = vmul.f32 %v252_v57, %v468_v1 }
 0x1ca   : > { %277 = vst [vmem:[%s157_s28 + $0x20] sm:$0xff] %v269_v58  ;;  %278 = vst [vmem:[%s157_s28 + $0x28] sm:$0xff] %v270_v59 }
 0x1cb   : > { %273 = vst [vmem:[%s157_s28] sm:$0xff] %v265_v60  ;;  %274 = vst [vmem:[%s157_s28 + $0x8] sm:$0xff] %v266_v61  ;;  %v256_v62 = vpop.permute.xlu1 %255 }
 0x1cc   : > { %v267_v63 = vmul.f32 %v256_v62, %v476_v5  ;;  %v268_v3 = vmul.f32 %v256_v62, %v478_v6 }
 0x1ce   : > { %275 = vst [vmem:[%s157_s28 + $0x10] sm:$0xff] %v267_v63  ;;  %276 = vst [vmem:[%s157_s28 + $0x18] sm:$0xff] %v268_v3 }
 0x1cf   : > { %v264_v7 = vpop.permute.xlu1 %263 }
 0x1d0   : > { %v271_v2 = vmul.f32 %v264_v7, %v482_v8  ;;  %v272_v4 = vmul.f32 %v264_v7, %v484_v9 }
 0x1d2   : > { %279 = vst [vmem:[%s157_s28 + $0x30] sm:$0xff] %v271_v2  ;;  %280 = vst [vmem:[%s157_s28 + $0x38] sm:$0xff] %v272_v4 }
 0x1d3 PF: > { %s13_s9 = sadd.s32 1, %s416_s9  }
 0x1d4   : > { %p10_p1 = scmp.ge.s32.totalorder %s13_s9, 4  }
 0x1d6   :  { %12 = sbr.rel (!%p10_p1) target bundleno = 1 (0x1), region = 63 }
 0x1db   :  { %302 = vsyncpa [#allocation3], 1 }
 0x1dc   :  { %304 = vsyncpa [#allocation3 + $0x1], 1 }

</bundles_post_ra>
